<compile_context>
chip_gen: v5e
topology: v5e:2x2
jax: 0.10.0
libtpu: 0.0.40
codegen_flags: <defaults>
</compile_context>

<pallas_src>
import math
import jax
import jax.numpy as jnp
from jax.experimental import pallas as pl
from jax.experimental.pallas import tpu as pltpu


def _swiglu_core(x, w13, w2_t):
    """(tm, d_model) x (d_model, 2*tk) x (tk, d_model) -> (tm, d_model) f32."""
    a = jnp.dot(x, w13, preferred_element_type=jnp.float32)   # MXU, f32 acc
    tk = a.shape[-1] // 2
    a1 = a[:, :tk]          # x @ w1^T  (gate)   -- lane-aligned static slice
    a3 = a[:, tk:]          # x @ w3^T  (up)
    # SiLU in f32: sigmoid -> EUP slot, muls -> VPU (free filler once MXU-bound)
    h = (a1 * jax.nn.sigmoid(a1)) * a3
    return jnp.dot(h.astype(w2_t.dtype), w2_t,
                   preferred_element_type=jnp.float32)


def _swiglu_kernel_acc(x_ref, w13_ref, w2_ref, o_ref, acc_ref):
    """Multi d_ff-tile path: grid = (rows, ff_tiles), acc over trailing axis."""
    j = pl.program_id(1)

    @pl.when(j == 0)
    def _():
        acc_ref[...] = jnp.zeros_like(acc_ref)

    acc_ref[...] += _swiglu_core(x_ref[...], w13_ref[...], w2_ref[...])

    @pl.when(j == pl.num_programs(1) - 1)
    def _():
        o_ref[...] = acc_ref[...].astype(o_ref.dtype)


def _swiglu_kernel_single(x_ref, w13_ref, w2_ref, o_ref):
    """Single d_ff-tile path: no scratch, direct store."""
    o_ref[...] = _swiglu_core(x_ref[...], w13_ref[...], w2_ref[...]).astype(o_ref.dtype)


def _round_up(x, m):
    return ((x + m - 1) // m) * m


def swiglu_pallas(x, w1, w2, w3, *, tile_m=256, tile_ff=512,
                  compute_dtype=None, vmem_budget_bytes=40 * 1024 * 1024):
    """SwiGLU forward.

    x: (..., d_model);  w1, w3: (d_ff, d_model);  w2: (d_model, d_ff)
    compute_dtype: optionally cast x / weights (e.g. jnp.bfloat16 on v6e/v7x);
    accumulation and the SiLU math stay in f32; output keeps x's dtype.
    """
    d_ff, d_model = w1.shape
    assert x.shape[-1] == d_model
    assert w3.shape == (d_ff, d_model) and w2.shape == (d_model, d_ff)

    out_dtype = x.dtype
    lead_shape = x.shape[:-1]
    xf = x.reshape(-1, d_model)
    M = xf.shape[0]

    if compute_dtype is not None:
        xf = xf.astype(compute_dtype)
        w1 = w1.astype(compute_dtype)
        w2 = w2.astype(compute_dtype)
        w3 = w3.astype(compute_dtype)

    x_bytes = jnp.dtype(xf.dtype).itemsize
    w_bytes = jnp.dtype(w1.dtype).itemsize
    o_bytes = jnp.dtype(out_dtype).itemsize

    # ---- tile selection (sublane-aligned rows, lane-aligned d_ff tiles) ----
    sub = 16 if x_bytes == 2 else 8
    tm = max(sub, (min(tile_m, _round_up(M, sub)) // sub) * sub)
    if d_ff >= 128:
        tk = max(128, (min(tile_ff, d_ff) // 128) * 128)
    else:
        tk = d_ff  # tiny model: single ff tile equals the full dim

    def vmem_est(tm_, tk_):
        return (2 * tm_ * d_model * x_bytes            # x tile (double buffered)
                + 2 * d_model * 2 * tk_ * w_bytes      # fused w1|w3 tile
                + 2 * tk_ * d_model * w_bytes          # w2^T tile
                + 2 * tm_ * d_model * o_bytes          # output tile
                + tm_ * d_model * 4                    # f32 accumulator scratch
                + tm_ * 3 * tk_ * 4 + tm_ * tk_ * w_bytes)  # a / h temporaries

    while vmem_est(tm, tk) > vmem_budget_bytes and tk > 128:
        tk = max(128, (tk // 2 // 128) * 128)
    while vmem_est(tm, tk) > vmem_budget_bytes and tm > sub:
        tm = max(sub, (tm // 2 // sub) * sub)

    # ---- one-time weight layout change (outside the kernel) ---------------
    # Pre-transpose and interleave w1/w3 per d_ff tile so that
    #   w13t[:, 2*tk*j : 2*tk*j+tk]     = w1.T[:, tk*j : tk*(j+1)]
    #   w13t[:, 2*tk*j+tk : 2*tk*(j+1)] = w3.T[:, tk*j : tk*(j+1)]
    # Zero-padding d_ff is semantically a no-op: silu(0) * 0 = 0 and the padded
    # w2 rows are zero, so padded columns contribute nothing to the output.
    pad_ff = (-d_ff) % tk
    w1t, w3t, w2p = w1.T, w3.T, w2
    if pad_ff:
        w1t = jnp.pad(w1t, ((0, 0), (0, pad_ff)))
        w3t = jnp.pad(w3t, ((0, 0), (0, pad_ff)))
        w2p = jnp.pad(w2p, ((0, 0), (0, pad_ff)))
    d_ff_p = d_ff + pad_ff
    n_ff = d_ff_p // tk
    w13t = jnp.concatenate(
        [w1t.reshape(d_model, n_ff, tk), w3t.reshape(d_model, n_ff, tk)],
        axis=-1).reshape(d_model, 2 * d_ff_p)
    w2t = w2p.T  # (d_ff_p, d_model)

    n_rows = pl.cdiv(M, tm)

    cost = pl.CostEstimate(
        flops=2 * M * d_model * d_ff * 3,
        transcendentals=M * d_ff,
        bytes_accessed=(M * d_model * (x_bytes + o_bytes)
                        + 3 * d_ff * d_model * w_bytes * max(1, n_rows)),
    )
    cparams = pltpu.CompilerParams(
        dimension_semantics=("parallel", "arbitrary") if n_ff > 1 else ("parallel",),
        vmem_limit_bytes=48 * 1024 * 1024,  # per-TC; safe on v5e/v6e/v7x
    )

    if n_ff > 1:
        grid = (n_rows, n_ff)  # rows parallel, d_ff reduction axis last
        out = pl.pallas_call(
            _swiglu_kernel_acc,
            out_shape=jax.ShapeDtypeStruct((M, d_model), out_dtype),
            grid_spec=pltpu.PrefetchScalarGridSpec(
                num_scalar_prefetch=0,
                grid=grid,
                in_specs=[
                    pl.BlockSpec((tm, d_model), lambda i, j: (i, 0)),      # x rows
                    pl.BlockSpec((d_model, 2 * tk), lambda i, j: (0, j)),  # w1|w3 tile
                    pl.BlockSpec((tk, d_model), lambda i, j: (j, 0)),      # w2^T tile
                ],
                out_specs=pl.BlockSpec((tm, d_model), lambda i, j: (i, 0)),
                scratch_shapes=[pltpu.VMEM((tm, d_model), jnp.float32)],
            ),
            compiler_params=cparams,
            cost_estimate=cost,
        )(xf, w13t, w2t)
    else:
        out = pl.pallas_call(
            _swiglu_kernel_single,
            out_shape=jax.ShapeDtypeStruct((M, d_model), out_dtype),
            grid_spec=pltpu.PrefetchScalarGridSpec(
                num_scalar_prefetch=0,
                grid=(n_rows,),
                in_specs=[
                    pl.BlockSpec((tm, d_model), lambda i: (i, 0)),
                    pl.BlockSpec((d_model, 2 * tk), lambda i: (0, 0)),
                    pl.BlockSpec((tk, d_model), lambda i: (0, 0)),
                ],
                out_specs=pl.BlockSpec((tm, d_model), lambda i: (i, 0)),
            ),
            compiler_params=cparams,
            cost_estimate=cost,
        )(xf, w13t, w2t)

    return out.reshape(*lead_shape, d_model)


# ---------------------------------------------------------------------------
# Parameter init matching torch.nn.init.trunc_normal_(std, a=-3*std, b=3*std)
# ---------------------------------------------------------------------------
def _trunc_normal(key, shape, std):
    return std * jax.random.truncated_normal(key, -3.0, 3.0, shape, jnp.float32)


def make_swiglu_params(key, d_model, d_ff):
    k1, k2, k3 = jax.random.split(key, 3)
    std1 = math.sqrt(2.0 / (d_ff + d_model))
    std2 = math.sqrt(2.0 / (d_model + d_ff))
    w1 = _trunc_normal(k1, (d_ff, d_model), std1)   # Linear(d_model -> d_ff)
    w2 = _trunc_normal(k2, (d_model, d_ff), std2)   # Linear(d_ff -> d_model)
    w3 = _trunc_normal(k3, (d_ff, d_model), std1)   # Linear(d_model -> d_ff)
    return w1, w2, w3


def _ref_swiglu(x, w1, w2, w3):
    a1 = jnp.einsum("fd,...d->...f", w1, x)
    a3 = jnp.einsum("fd,...d->...f", w3, x)
    return jnp.einsum("df,...f->...d", w2, (a1 * jax.nn.sigmoid(a1)) * a3)


if __name__ == "__main__":
    key = jax.random.PRNGKey(0)

    # --- test 1: small shapes, single ff tile (1-D grid path), f32 ---------
    kx, kp, key = jax.random.split(key, 3)
    batch, seq, d_model, d_ff = 2, 8, 32, 64
    x = jax.random.normal(kx, (batch, seq, d_model), jnp.float32)
    w1, w2, w3 = make_swiglu_params(kp, d_model, d_ff)

    out = jax.block_until_ready(swiglu_pallas(x, w1, w2, w3))
    ref = _ref_swiglu(x, w1, w2, w3)
    assert out.shape == (batch, seq, d_model)
    assert jnp.allclose(out, ref, atol=1e-3, rtol=1e-3), "test1 mismatch"

    # --- test 2: ragged M block + multi-tile d_ff accumulation + padding ---
    kx2, kp2, key = jax.random.split(key, 3)
    b2, s2, dm2, dff2 = 3, 5, 128, 320          # M=15 (ragged), d_ff padded to 384
    x2 = jax.random.normal(kx2, (b2, s2, dm2), jnp.float32)
    w1b, w2b, w3b = make_swiglu_params(kp2, dm2, dff2)

    out2 = jax.block_until_ready(swiglu_pallas(x2, w1b, w2b, w3b, tile_ff=128))
    ref2 = _ref_swiglu(x2, w1b, w2b, w3b)
    assert out2.shape == (b2, s2, dm2)
    assert jnp.allclose(out2, ref2, atol=2e-3, rtol=2e-3), "test2 mismatch"

    # --- test 3: bf16 compute path (v6e/v7x-style), f32 accumulation -------
    out3 = jax.block_until_ready(
        swiglu_pallas(x, w1, w2, w3, compute_dtype=jnp.bfloat16))
    ref3 = _ref_swiglu(x.astype(jnp.bfloat16).astype(jnp.float32),
                       w1.astype(jnp.bfloat16).astype(jnp.float32),
                       w2.astype(jnp.bfloat16).astype(jnp.float32),
                       w3.astype(jnp.bfloat16).astype(jnp.float32))
    assert jnp.allclose(out3, ref3, atol=5e-2, rtol=5e-2), "test3 mismatch"

    print("KERNEL_OK")
</pallas_src>

<mosaic_0001>
module attributes {stable_mosaic.version = 11 : i64} {
  func.func @_swiglu_kernel_single(%arg0: i32, %arg1: memref<16x32xf32, #tpu.memory_space<vmem>>, %arg2: memref<32x128xf32, #tpu.memory_space<vmem>>, %arg3: memref<64x32xf32, #tpu.memory_space<vmem>>, %arg4: memref<16x32xf32, #tpu.memory_space<vmem>>) attributes {dimension_semantics = [#tpu.dimension_semantics<parallel>], iteration_bounds = array<i64: 1>, scalar_prefetch = 0 : i64, scratch_operands = 0 : i64, tpu.core_type = #tpu.core_type<tc>, window_params = [{transform_indices = @transform_0, window_bounds = array<i64: 16, 32>}, {pipeline_mode = #tpu.pipeline_mode<synchronous>, transform_indices = @transform_1, window_bounds = array<i64: 32, 128>}, {pipeline_mode = #tpu.pipeline_mode<synchronous>, transform_indices = @transform_2, window_bounds = array<i64: 64, 32>}, {transform_indices = @transform_3, window_bounds = array<i64: 16, 32>}]} {
    %c0 = arith.constant 0 : index
    %c0_0 = arith.constant 0 : index
    %0 = vector.load %arg1[%c0, %c0_0] : memref<16x32xf32, #tpu.memory_space<vmem>>, vector<16x32xf32>
    %c0_1 = arith.constant 0 : index
    %c0_2 = arith.constant 0 : index
    %1 = vector.load %arg2[%c0_1, %c0_2] : memref<32x128xf32, #tpu.memory_space<vmem>>, vector<32x128xf32>
    %c0_3 = arith.constant 0 : index
    %c0_4 = arith.constant 0 : index
    %2 = vector.load %arg3[%c0_3, %c0_4] : memref<64x32xf32, #tpu.memory_space<vmem>>, vector<64x32xf32>
    %cst = arith.constant dense<0.000000e+00> : vector<16x128xf32>
    %3 = tpu.matmul %0, %1, %cst {dimension_numbers = #tpu.dot_dimension_numbers<[1], [0], [0], [1], [0, 0, 1, 1], [], []>} : vector<16x32xf32>, vector<32x128xf32>, vector<16x128xf32> -> vector<16x128xf32>
    %4 = vector.extract_strided_slice %3 {offsets = [0, 0], sizes = [16, 64], strides = [1, 1]} : vector<16x128xf32> to vector<16x64xf32>
    %5 = vector.extract_strided_slice %3 {offsets = [0, 64], sizes = [16, 64], strides = [1, 1]} : vector<16x128xf32> to vector<16x64xf32>
    %6 = arith.negf %4 : vector<16x64xf32>
    %7 = math.exp %6 : vector<16x64xf32>
    %cst_5 = arith.constant 1.000000e+00 : f32
    %8 = vector.broadcast %cst_5 : f32 to vector<16x64xf32>
    %9 = arith.addf %8, %7 : vector<16x64xf32>
    %10 = arith.divf %8, %9 : vector<16x64xf32>
    %11 = arith.mulf %4, %10 : vector<16x64xf32>
    %12 = arith.mulf %11, %5 : vector<16x64xf32>
    %cst_6 = arith.constant dense<0.000000e+00> : vector<16x32xf32>
    %13 = tpu.matmul %12, %2, %cst_6 {dimension_numbers = #tpu.dot_dimension_numbers<[1], [0], [0], [1], [0, 0, 1, 1], [], []>} : vector<16x64xf32>, vector<64x32xf32>, vector<16x32xf32> -> vector<16x32xf32>
    %c0_7 = arith.constant 0 : index
    %c0_8 = arith.constant 0 : index
    %14 = vector.load %arg4[%c0_7, %c0_8] : memref<16x32xf32, #tpu.memory_space<vmem>>, vector<16x32xf32>
    tpu.vector_store %arg4[%c0_7, %c0_8], %13 {strides = array<i32>} : memref<16x32xf32, #tpu.memory_space<vmem>>, vector<16x32xf32>,
    return
  }
  func.func @transform_0(%arg0: i32) -> (i32, i32) {
    %c0_i32 = arith.constant 0 : i32
    %c0_i32_0 = arith.constant 0 : i32
    return %arg0, %c0_i32 : i32, i32
  }
  func.func @transform_1(%arg0: i32) -> (i32, i32) {
    %c0_i32 = arith.constant 0 : i32
    %c0_i32_0 = arith.constant 0 : i32
    %c0_i32_1 = arith.constant 0 : i32
    return %c0_i32, %c0_i32_0 : i32, i32
  }
  func.func @transform_2(%arg0: i32) -> (i32, i32) {
    %c0_i32 = arith.constant 0 : i32
    %c0_i32_0 = arith.constant 0 : i32
    %c0_i32_1 = arith.constant 0 : i32
    return %c0_i32, %c0_i32_0 : i32, i32
  }
  func.func @transform_3(%arg0: i32) -> (i32, i32) {
    %c0_i32 = arith.constant 0 : i32
    %c0_i32_0 = arith.constant 0 : i32
    return %arg0, %c0_i32 : i32, i32
  }
}

</mosaic_0001>

<bundles_post_ra>
// kernel: tpu_custom_call.1
= control target key start
LH: loop header
LB: loop body
LE: loop exit
PB: predicated region body
PF: predicated region fallthrough
CT: control target
= control target key end

     0   :  { %s288_s0 = inlined_call_operand.vmem [shape: f32[16,32], index: 0, kind: input, shape index: {}]   ;;  %s289_s1 = inlined_call_operand.vmem [shape: f32[32,128], index: 1, kind: input, shape index: {}]   ;;  %s290_s2 = inlined_call_operand.vmem [shape: f32[64,32], index: 2, kind: input, shape index: {}]   ;;  %s291_s3 = inlined_call_operand.hbm [shape: f32[16,32], index: 3, kind: output, shape index: {}]  }
   0x1   :  { %v20_v0 = vld [vmem:[%s289_s1 + $0x18] sm:$0xff]  ;;  %v19_v1 = vld [vmem:[%s289_s1 + $0x10] sm:$0xff]  ;;  %v18_v2 = vld [vmem:[%s289_s1 + $0x8] sm:$0xff] }
   0x2   :  { %48 = vmatpush.msra.mxu0 %v20_v0  ;;  %165 = vmatpush.msra.mxu3 %v20_v0 }
   0x3   :  { %8 = vsyncpa [#allocation3], 0  ;;  %v17_v3 = vld [vmem:[%s289_s1] sm:$0xff]  ;;  %vm29_vm0 = vcmask 261120   ;;  %v16_v5 = vld [vmem:[%s288_s0 + $0x8] sm:$0xff]  ;;  %vm109_vm8 = vcmask 523264  }
   0x4   :  { %49 = vmatpush.msra.mxu0 %v19_v1  ;;  %166 = vmatpush.msra.mxu3 %v19_v1  ;;  %v15_v4 = vld [vmem:[%s288_s0] sm:$0xff]  ;;  %v28_v6 = vld [vmem:[%s290_s2 + $0x38] sm:$0xff]  ;;  %v27_v7 = vld [vmem:[%s290_s2 + $0x30] sm:$0xff]  ;;  %s215_s0 = smov 64   ;;  %s147_s15 = sshll.u32 %s291_s3, 4  ;;  %s148_s15 = int_to_ptr.hbm [resolvable:$true] %s147_s15 }
   0x5   :  { %169 = vmatpush.msra.mxu2 %v28_v6  ;;  %124 = vmatpush.msra.mxu1 %v28_v6  ;;  %v26_v8 = vld [vmem:[%s290_s2 + $0x28] sm:$0xff]  ;;  %v25_v10 = vld [vmem:[%s290_s2 + $0x20] sm:$0xff]  ;;  %v24_v11 = vld [vmem:[%s290_s2 + $0x18] sm:$0xff]  ;;  %s217_s16 = smov 128   ;;  %s218_s17 = smov 8  }
   0x6   :  { %50 = vmatpush.msra.mxu0 %v18_v2  ;;  %167 = vmatpush.msra.mxu3 %v18_v2  ;;  %v23_v12 = vld [vmem:[%s290_s2 + $0x10] sm:$0xff]  ;;  %v22_v13 = vld [vmem:[%s290_s2 + $0x8] sm:$0xff]  ;;  %v21_v20 = vld [vmem:[%s290_s2] sm:$0xff]  ;;  %s216_s2 = smov [#allocation2]  }
   0x7   :  { %170 = vmatpush.msra.mxu2 %v27_v7  ;;  %125 = vmatpush.msra.mxu1 %v27_v7  ;;  %s145_s12 = sshll.u32 %s216_s2, 4  ;;  %s146_s12 = int_to_ptr.vmem [resolvable:$true] %s145_s12 }
   0x8   :  { %51 = vmatpush.msra.mxu0 %v17_v3  ;;  %168 = vmatpush.msra.mxu3 %v17_v3 }
   0x9   :  { %159 = vmatmul.msk.f32.vlgmr.msra.gmra.mxu0 %vm29_vm0, %v15_v4  ;;  %160 = vmatmul.msk.f32.vlgmr.msra.gmra.mxu3 %vm29_vm0, %v16_v5 }
   0xa   :  { %171 = vmatpush.msra.mxu2 %v26_v8  ;;  %126 = vmatpush.msra.mxu1 %v26_v8 }
   0xc   :  { %172 = vmatpush.msra.mxu2 %v25_v10  ;;  %127 = vmatpush.msra.mxu1 %v25_v10 }
   0xe   :  { %173 = vmatpush.msra.mxu2 %v24_v11  ;;  %128 = vmatpush.msra.mxu1 %v24_v11 }
  0x10   :  { %174 = vmatpush.msra.mxu2 %v23_v12  ;;  %129 = vmatpush.msra.mxu1 %v23_v12 }
  0x12   :  { %175 = vmatpush.msra.mxu2 %v22_v13  ;;  %130 = vmatpush.msra.mxu1 %v22_v13 }
  0x14   :  { %176 = vmatpush.msra.mxu2 %v21_v20  ;;  %131 = vmatpush.msra.mxu1 %v21_v20 }
  0x86   :  { %v53_v14 = vpop.f32.mrf.mxu0 }
  0x87   :  { %v161_v16 = vmul.f32 -1.442695, %v53_v14 }
  0x8c   :  { %v56_v9 = vpop.f32.mrf.mxu3 }
  0x8d   :  { %103 = vrot.lane.b32.xlu0 %v56_v9, %s215_s0  ;;  %v162_v15 = vmul.f32 -1.442695, %v56_v9 }
  0x8f   :  { %181 = vpow2.f32 %v162_v15 }
  0x90   :  { %183 = vpow2.f32 %v161_v16 }
  0x95   :  { %101 = vrot.lane.b32.xlu0 %v53_v14, %s215_s0  ;;  %v182_v17 = vpop.eup %181 }
  0x96   :  { %v66_v18 = vadd.f32 1.0, %v182_v17  ;;  %v184_v19 = vpop.eup %183 }
  0x97   :  { %v65_v21 = vadd.f32 1.0, %v184_v19 }
  0x98   :  { %185 = vrcp.f32 %v66_v18  ;;  %v93_v30 = vand.u32 2147483648, %v66_v18  ;;  %vm87_vm2 = vweird.f32 %v66_v18  ;;  %v91_v31 = vand.u32 2147483647, %v66_v18 }
  0x99   :  { %187 = vrcp.f32 %v65_v21  ;;  %vm72_vm4 = vweird.f32 %v65_v21  ;;  %v78_v35 = vand.u32 2147483648, %v65_v21  ;;  %v76_v38 = vand.u32 2147483647, %v65_v21 }
  0x9a   :  { %v94_v34 = vor.u32 1.1754944e-38, %v93_v30  ;;  %vm92_vm6 = vcmp.eq.f32.partialorder %v91_v31, 8.507059e+37 }
  0x9b   :  { %v79_v40 = vor.u32 1.1754944e-38, %v78_v35  ;;  %vm77_vm9 = vcmp.eq.f32.partialorder %v76_v38, 8.507059e+37 }
  0x9e   :  { %v186_v22 = vpop.eup %185 }
  0x9f   :  { %v83_v23 = vmul.f32 %v186_v22, %v66_v18  ;;  %v188_v25 = vpop.eup %187  ;;  %vm88_vm1 = vweird.f32 %v186_v22 }
  0xa0   :  { %v68_v26 = vmul.f32 %v188_v25, %v65_v21  ;;  %vm89_vm3 = vmor %vm87_vm2, %vm88_vm1  ;;  %vm73_vm5 = vweird.f32 %v188_v25 }
  0xa1   :  { %v84_v24 = vsub.f32 1.0, %v83_v23  ;;  %vm74_vm7 = vmor %vm72_vm4, %vm73_vm5 }
  0xa2   :  { %v69_v28 = vsub.f32 1.0, %v68_v26 }
  0xa3   :  { %v85_v27 = vmul.f32 %v186_v22, %v84_v24 }
  0xa4   :  { %v70_v32 = vmul.f32 %v188_v25, %v69_v28 }
  0xa5   :  { %v86_v29 = vadd.f32 %v186_v22, %v85_v27 }
  0xa6   :  { %v71_v37 = vadd.f32 %v188_v25, %v70_v32 }
  0xa7   :  { %v90_v33 = vsel %vm89_vm3, %v186_v22, %v86_v29 }
  0xa8   :  { %v95_v36 = vsel %vm92_vm6, %v94_v34, %v90_v33  ;;  %v75_v42 = vsel %vm74_vm7, %v188_v25, %v71_v37 }
  0xa9   :  { %v98_v39 = vmul.f32 %v95_v36, %v56_v9  ;;  %v80_v44 = vsel %vm77_vm9, %v79_v40, %v75_v42 }
  0xaa   :  { %v97_v45 = vmul.f32 %v80_v44, %v53_v14 }
  0xff   :  { %v104_v41 = vpop.permute.xlu0 %103 }
 0x100   :  { %v108_v43 = vmul.f32 %v104_v41, %v98_v39 }
 0x102   :  { %164 = vmatmul.msk.f32.vlgmr.msra.gmra.mxu2 %vm109_vm8, %v108_v43 }
 0x107   :  { %v102_v46 = vpop.permute.xlu0 %101 }
 0x108   :  { %v107_v47 = vmul.f32 %v102_v46, %v97_v45 }
 0x10a   :  { %163 = vmatmul.msk.f32.vlgmr.msra.gmra.mxu1 %vm109_vm8, %v107_v47 }
 0x185   :  { %v136_v48 = vpop.f32.mrf.mxu2 }
 0x186   :  { %140 = vst.msk [vmem:[#allocation2 + $0x8] sm:$0xff] %vm29_vm0, %v136_v48 }
 0x187   :  { %v133_v49 = vpop.f32.mrf.mxu1 }
 0x188   :  { %139 = vst.msk [vmem:[#allocation2] sm:$0xff] %vm29_vm0, %v133_v49 }
 0x189   :  { %153 = dma.vmem_to_hbm [thread:$0]  %s146_s12, 256, %s148_s15, [#allocation3], %s217_s16, %s217_s16, %s218_s17  }
 0x18a   :  { %213 = dma.done.wait [#allocation3], 256  }
 0x18b   :  { %214 = vsyncadd [#allocation3], 4294967040 }
 0x18c   :  { %158 = vsyncpa [#allocation3], 1 }

</bundles_post_ra>
